<compile_context>
chip_gen: v7x
topology: tpu7x:2x2x1
jax: 0.10.0
libtpu: 0.0.40
codegen_flags: <defaults>
</compile_context>

<pallas_src>
import functools

import jax
import jax.numpy as jnp
from jax import lax
from jax.experimental import pallas as pl
from jax.experimental.pallas import tpu as pltpu

OBS_DIM = 8                          # LunarLander-v2 observation_space.shape[0]
N_ACTIONS = 4                        # LunarLander-v2 action_space.n
INPUT_N_STATES = 4
IN_DIM = OBS_DIM * INPUT_N_STATES    # 32
HIDDEN = 64
WIDE = 2 * HIDDEN                    # 128-lane working width (lane-dense)
LEAKY_SLOPE = 0.01                   # F.leaky_relu default negative_slope

# ---- packed-parameter slab row layout (all section starts 16-row aligned so the
# ---- bf16 (16,128) sublane tiles of every static slice stay aligned) -----------
_W1_R0, _W1_R1 = 0, 32        # (32,128): cols 0:64 = w1                  (lin_1)
_B1_ROW = 32                  # row     : cols 0:64 = b1
_W2_R0, _W2_R1 = 48, 176      # (128,128): rows 0:64 = [w2a | w2b_x]      (lin_2a & lin_2b x-part)
_B2_ROW = 176                 # row     : cols 0:64 = b2a, 64:128 = b2b
_WSEL_R0, _WSEL_R1 = 192, 320  # (128,128): rows 0:4, cols 64:128 = w2b_a (one-hot action rows, MXU)
_WOA_R0, _WOA_R1 = 320, 448   # (128,128): rows 0:64, cols 0:4 = woa      (lin_oA)
_WOB_R0, _WOB_R1 = 448, 576   # (128,128): rows 64:128, cols 4:36 = wob   (lin_oB)
_BO_ROW = 576                 # row     : cols 0:4 = boa, cols 4:36 = bob
P_ROWS = 592                  # = 16 * 37

_TB_CAP = 2048                # per-step VMEM ~8 MB at this cap (fits all gens)
_ALIGN = 16                   # bf16 sublane-tile alignment for the batch dim


def _leaky_relu(v):
    # mul + max (2 VALU ops) instead of cmp + select + mul
    return jnp.maximum(v, LEAKY_SLOPE * v)


def _elementwise_dtype():
    """bf16 elementwise on chips with a native-bf16 VPU (v6e/v7x), f32 otherwise."""
    try:
        kind = jax.devices()[0].device_kind.lower()
    except Exception:
        return jnp.float32
    return jnp.bfloat16 if any(t in kind for t in ("v6", "v7")) else jnp.float32


def dqn_kernel(x_ref, p_ref, out_ref, *, ew_dtype):
    f32 = jnp.float32
    bf16 = jnp.bfloat16

    # Static, aligned carves of the packed bf16 parameter slab (free).
    w1 = p_ref[_W1_R0:_W1_R1, :]                        # (32, 128) bf16
    b1 = p_ref[_B1_ROW:_B1_ROW + 1, :].astype(f32)      # (1, 128)
    w2 = p_ref[_W2_R0:_W2_R1, :]                        # (128, 128) bf16
    b2 = p_ref[_B2_ROW:_B2_ROW + 1, :].astype(f32)      # (1, 128)
    wsel = p_ref[_WSEL_R0:_WSEL_R1, :]                  # (128, 128) bf16 (rows 0:4 = w2b_a)
    woa = p_ref[_WOA_R0:_WOA_R1, :]                     # (128, 128) bf16
    wob = p_ref[_WOB_R0:_WOB_R1, :]                     # (128, 128) bf16
    bo = p_ref[_BO_ROW:_BO_ROW + 1, :].astype(f32)      # (1, 128)

    x = x_ref[...]                                      # (tb, 32) bf16 (cast in wrapper)

    # Shared trunk: h = leaky_relu(lin_1(x)); cols 64:128 are exactly zero.
    h = _leaky_relu((jnp.dot(x, w1, preferred_element_type=f32) + b1).astype(ew_dtype))

    # Fused head pre-activations: cols 0:64 = lin_2a(h), cols 64:128 = lin_2b_x(h).
    pre = jnp.dot(h.astype(bf16), w2, preferred_element_type=f32) + b2       # (tb, 128) f32
    pre_ew = pre.astype(ew_dtype)
    lr_pre = _leaky_relu(pre_ew)

    # Q head: a sits lane-dense in cols 0:4 of a_wide (bo already holds boa|bob).
    a_wide = jnp.dot(lr_pre.astype(bf16), woa, preferred_element_type=f32) + bo

    # argmax over the 4 actions (first-occurrence tie-break, like torch.argmax).
    # NaN Q-values fall through to an all-zero one-hot (action term dropped) —
    # accepted edge case, same behavior as the previous version.
    col = lax.broadcasted_iota(jnp.int32, a_wide.shape, 1)
    a_masked = jnp.where(col < N_ACTIONS, a_wide, -jnp.inf)
    amax = jnp.max(a_masked, axis=1, keepdims=True)
    first_idx = jnp.min(jnp.where(a_masked == amax, col, WIDE),
                        axis=1, keepdims=True)                               # (tb, 1)

    # one_hot @ w2b_a on the (idle) MXU instead of 4 VPU broadcast FMAs.
    one_hot = jnp.where(col == first_idx, 1.0, 0.0).astype(bf16)             # (tb, 128)
    sel = jnp.dot(one_hot, wsel, preferred_element_type=ew_dtype)            # exact rows of w2b_a

    # Next-state head: hb = leaky_relu(pre_b + action contribution); lin_oB.
    hb = _leaky_relu(pre_ew + sel)
    out = a_wide + jnp.dot(hb.astype(bf16), wob, preferred_element_type=f32)

    # Single lane-dense (tb, 128) bf16 store: cols 0:4 = a, cols 4:36 = b, rest 0.
    out_ref[...] = out.astype(out_ref.dtype)


def _round_up(n, m):
    return ((n + m - 1) // m) * m


def _pick_tile_b(batch):
    b = _round_up(max(int(batch), 1), _ALIGN)
    if b <= _ALIGN:
        return _ALIGN
    # >= 2 grid steps whenever the batch allows: keeps both v7x TensorCores busy
    # under dimension_semantics=("parallel",) and overlaps DMA elsewhere; capped
    # so the per-step working set stays well inside scoped VMEM.
    return min(_TB_CAP, _round_up(pl.cdiv(b, 2), _ALIGN))


def custom_dqn_forward(x, packed_params):
    """x: (B, 32) float32 (or bf16), packed_params: (592, 128) bf16 slab.
    Returns (a, b): Q-values (B, 4) and next-state prediction (B, 32), float32."""
    B = x.shape[0]
    ew_dtype = _elementwise_dtype()

    tb = _pick_tile_b(B)
    b_pad = _round_up(B, tb)
    xb = x.astype(jnp.bfloat16)
    if b_pad != B:
        xb = jnp.pad(xb, ((0, b_pad - B), (0, 0)))
    grid = (b_pad // tb,)

    flops = 2 * b_pad * (IN_DIM * WIDE + 4 * WIDE * WIDE)
    bytes_accessed = (b_pad * (IN_DIM * 2 + WIDE * 2)           # bf16 in / bf16 out
                      + P_ROWS * WIDE * 2)                      # resident weight slab

    out = pl.pallas_call(
        functools.partial(dqn_kernel, ew_dtype=ew_dtype),
        out_shape=jax.ShapeDtypeStruct((b_pad, WIDE), jnp.bfloat16),
        grid=grid,
        in_specs=[
            pl.BlockSpec((tb, IN_DIM), lambda i: (i, 0)),       # batch-tiled x
            pl.BlockSpec((P_ROWS, WIDE), lambda i: (0, 0)),     # resident weights
        ],
        out_specs=pl.BlockSpec((tb, WIDE), lambda i: (i, 0)),
        compiler_params=pltpu.CompilerParams(
            dimension_semantics=("parallel",),                  # megacore on v7x
            vmem_limit_bytes=32 * 1024 * 1024),
        cost_estimate=pl.CostEstimate(flops=flops, transcendentals=0,
                                      bytes_accessed=bytes_accessed),
    )(xb, packed_params)

    a = out[:B, :N_ACTIONS].astype(jnp.float32)
    b = out[:B, N_ACTIONS:N_ACTIONS + IN_DIM].astype(jnp.float32)
    return a, b


def init_params(key):
    """nn.Linear-style U(-1/sqrt(fan_in), 1/sqrt(fan_in)) init; weights stored as
    (in_features, out_features). lin_2b's weight is pre-split into the trunk part
    (w2b_x) and the one-hot-action part (w2b_a)."""
    def linear(k, fan_in, fan_out):
        kw, kb = jax.random.split(k)
        bound = 1.0 / jnp.sqrt(fan_in)
        w = jax.random.uniform(kw, (fan_in, fan_out), jnp.float32, -bound, bound)
        b = jax.random.uniform(kb, (1, fan_out), jnp.float32, -bound, bound)
        return w, b

    k1, k2, k3, k4, k5 = jax.random.split(key, 5)
    w1, b1 = linear(k1, IN_DIM, HIDDEN)                 # lin_1 : 32 -> 64
    w2a, b2a = linear(k2, HIDDEN, HIDDEN)               # lin_2a: 64 -> 64
    woa, boa = linear(k3, HIDDEN, N_ACTIONS)            # lin_oA: 64 -> 4
    w2b, b2b = linear(k4, HIDDEN + N_ACTIONS, HIDDEN)   # lin_2b: 68 -> 64
    wob, bob = linear(k5, HIDDEN, IN_DIM)               # lin_oB: 64 -> 32
    return {
        "w1": w1, "b1": b1,
        "w2a": w2a, "b2a": b2a,
        "woa": woa, "boa": boa,
        "w2b_x": w2b[:HIDDEN, :], "w2b_a": w2b[HIDDEN:, :], "b2b": b2b,
        "wob": wob, "bob": bob,
    }


def pack_params(p):
    """Pack all layer parameters into one (592, 128) bf16 slab (single DMA)."""
    P = jnp.zeros((P_ROWS, WIDE), jnp.float32)
    P = P.at[_W1_R0:_W1_R1, 0:HIDDEN].set(p["w1"])
    P = P.at[_B1_ROW, 0:HIDDEN].set(p["b1"].reshape(HIDDEN))
    P = P.at[_W2_R0:_W2_R0 + HIDDEN, 0:HIDDEN].set(p["w2a"])
    P = P.at[_W2_R0:_W2_R0 + HIDDEN, HIDDEN:WIDE].set(p["w2b_x"])
    P = P.at[_B2_ROW, 0:HIDDEN].set(p["b2a"].reshape(HIDDEN))
    P = P.at[_B2_ROW, HIDDEN:WIDE].set(p["b2b"].reshape(HIDDEN))
    P = P.at[_WSEL_R0:_WSEL_R0 + N_ACTIONS, HIDDEN:WIDE].set(p["w2b_a"])
    P = P.at[_WOA_R0:_WOA_R0 + HIDDEN, 0:N_ACTIONS].set(p["woa"])
    P = P.at[_WOB_R0 + HIDDEN:_WOB_R1, N_ACTIONS:N_ACTIONS + IN_DIM].set(p["wob"])
    P = P.at[_BO_ROW, 0:N_ACTIONS].set(p["boa"].reshape(N_ACTIONS))
    P = P.at[_BO_ROW, N_ACTIONS:N_ACTIONS + IN_DIM].set(p["bob"].reshape(IN_DIM))
    return P.astype(jnp.bfloat16)


def reference_forward(x, p, ew_dtype, out_dtype=jnp.bfloat16):
    """Pure-JAX reference mirroring the kernel's numerics: bf16 matmul operands with
    f32 accumulation, leaky_relu / add in ew_dtype, bf16-rounded outputs."""
    f32 = jnp.float32
    bf = lambda t: t.astype(jnp.bfloat16)
    up = lambda t: t.astype(jnp.bfloat16).astype(f32)
    dot = lambda u, w: jnp.dot(bf(u), bf(w), preferred_element_type=f32)
    lr = lambda v: jnp.maximum(v, LEAKY_SLOPE * v)
    ew = lambda t: t.astype(ew_dtype)

    h = lr(ew(dot(x, p["w1"]) + up(p["b1"])))
    a2 = lr(ew(dot(h, p["w2a"]) + up(p["b2a"])))
    a = dot(a2, p["woa"]) + up(p["boa"])
    idx = jnp.argmax(a, axis=1)
    one_hot = jax.nn.one_hot(idx, N_ACTIONS, dtype=f32)
    pre_b = dot(h, p["w2b_x"]) + up(p["b2b"])
    sel = one_hot @ up(p["w2b_a"])
    hb = lr(ew(pre_b) + ew(sel))
    b = dot(hb, p["wob"]) + up(p["bob"])
    a = a.astype(out_dtype).astype(f32)
    b = b.astype(out_dtype).astype(f32)
    return a, b


if __name__ == "__main__":
    key = jax.random.PRNGKey(0)
    k_params, k_x = jax.random.split(key)

    params = init_params(k_params)
    packed = pack_params(params)

    B = 8
    x = jax.random.normal(k_x, (B, IN_DIM), dtype=jnp.float32)

    a_out, b_out = custom_dqn_forward(x, packed)
    jax.block_until_ready((a_out, b_out))

    a_ref, b_ref = reference_forward(x, params, _elementwise_dtype())
    assert a_out.shape == (B, N_ACTIONS) and b_out.shape == (B, IN_DIM)
    assert jnp.allclose(a_out, a_ref, atol=2e-3, rtol=2e-3)
    assert jnp.allclose(b_out, b_ref, atol=2e-3, rtol=2e-3)

    print("KERNEL_OK")
</pallas_src>

<mosaic_0001>
module attributes {stable_mosaic.version = 11 : i64} {
  func.func @dqn_kernel(%arg0: i32, %arg1: memref<16x32xbf16, #tpu.memory_space<vmem>>, %arg2: memref<592x128xbf16, #tpu.memory_space<vmem>>, %arg3: memref<16x128xbf16, #tpu.memory_space<vmem>>) attributes {dimension_semantics = [#tpu.dimension_semantics<parallel>], iteration_bounds = array<i64: 1>, scalar_prefetch = 0 : i64, scratch_operands = 0 : i64, tpu.core_type = #tpu.core_type<tc>, window_params = [{transform_indices = @transform_0, window_bounds = array<i64: 16, 32>}, {pipeline_mode = #tpu.pipeline_mode<synchronous>, transform_indices = @transform_1, window_bounds = array<i64: 592, 128>}, {transform_indices = @transform_2, window_bounds = array<i64: 16, 128>}]} {
    %c0 = arith.constant 0 : index
    %c0_0 = arith.constant 0 : index
    %0 = vector.load %arg2[%c0, %c0_0] : memref<592x128xbf16, #tpu.memory_space<vmem>>, vector<32x128xbf16>
    %c32 = arith.constant 32 : index
    %c0_1 = arith.constant 0 : index
    %1 = vector.load %arg2[%c32, %c0_1] : memref<592x128xbf16, #tpu.memory_space<vmem>>, vector<1x128xbf16>
    %2 = arith.extf %1 : vector<1x128xbf16> to vector<1x128xf32>
    %c48 = arith.constant 48 : index
    %c0_2 = arith.constant 0 : index
    %3 = vector.load %arg2[%c48, %c0_2] : memref<592x128xbf16, #tpu.memory_space<vmem>>, vector<128x128xbf16>
    %c176 = arith.constant 176 : index
    %c0_3 = arith.constant 0 : index
    %4 = vector.load %arg2[%c176, %c0_3] : memref<592x128xbf16, #tpu.memory_space<vmem>>, vector<1x128xbf16>
    %5 = arith.extf %4 : vector<1x128xbf16> to vector<1x128xf32>
    %c192 = arith.constant 192 : index
    %c0_4 = arith.constant 0 : index
    %6 = vector.load %arg2[%c192, %c0_4] : memref<592x128xbf16, #tpu.memory_space<vmem>>, vector<128x128xbf16>
    %c320 = arith.constant 320 : index
    %c0_5 = arith.constant 0 : index
    %7 = vector.load %arg2[%c320, %c0_5] : memref<592x128xbf16, #tpu.memory_space<vmem>>, vector<128x128xbf16>
    %c448 = arith.constant 448 : index
    %c0_6 = arith.constant 0 : index
    %8 = vector.load %arg2[%c448, %c0_6] : memref<592x128xbf16, #tpu.memory_space<vmem>>, vector<128x128xbf16>
    %c576 = arith.constant 576 : index
    %c0_7 = arith.constant 0 : index
    %9 = vector.load %arg2[%c576, %c0_7] : memref<592x128xbf16, #tpu.memory_space<vmem>>, vector<1x128xbf16>
    %10 = arith.extf %9 : vector<1x128xbf16> to vector<1x128xf32>
    %c0_8 = arith.constant 0 : index
    %c0_9 = arith.constant 0 : index
    %11 = vector.load %arg1[%c0_8, %c0_9] : memref<16x32xbf16, #tpu.memory_space<vmem>>, vector<16x32xbf16>
    %cst = arith.constant dense<0.000000e+00> : vector<16x128xf32>
    %12 = tpu.matmul %11, %0, %cst {dimension_numbers = #tpu.dot_dimension_numbers<[1], [0], [0], [1], [0, 0, 1, 1], [], []>} : vector<16x32xbf16>, vector<32x128xbf16>, vector<16x128xf32> -> vector<16x128xf32>
    %13 = vector.broadcast %2 : vector<1x128xf32> to vector<16x128xf32>
    %14 = arith.addf %12, %13 : vector<16x128xf32>
    %cst_10 = arith.constant 0.00999999977 : f32
    %15 = vector.broadcast %cst_10 : f32 to vector<16x128xf32>
    %16 = arith.mulf %15, %14 : vector<16x128xf32>
    %17 = arith.maximumf %14, %16 : vector<16x128xf32>
    %18 = arith.truncf %17 : vector<16x128xf32> to vector<16x128xbf16>
    %cst_11 = arith.constant dense<0.000000e+00> : vector<16x128xf32>
    %19 = tpu.matmul %18, %3, %cst_11 {dimension_numbers = #tpu.dot_dimension_numbers<[1], [0], [0], [1], [0, 0, 1, 1], [], []>} : vector<16x128xbf16>, vector<128x128xbf16>, vector<16x128xf32> -> vector<16x128xf32>
    %20 = vector.broadcast %5 : vector<1x128xf32> to vector<16x128xf32>
    %21 = arith.addf %19, %20 : vector<16x128xf32>
    %cst_12 = arith.constant 0.00999999977 : f32
    %22 = vector.broadcast %cst_12 : f32 to vector<16x128xf32>
    %23 = arith.mulf %22, %21 : vector<16x128xf32>
    %24 = arith.maximumf %21, %23 : vector<16x128xf32>
    %25 = arith.truncf %24 : vector<16x128xf32> to vector<16x128xbf16>
    %cst_13 = arith.constant dense<0.000000e+00> : vector<16x128xf32>
    %26 = tpu.matmul %25, %7, %cst_13 {dimension_numbers = #tpu.dot_dimension_numbers<[1], [0], [0], [1], [0, 0, 1, 1], [], []>} : vector<16x128xbf16>, vector<128x128xbf16>, vector<16x128xf32> -> vector<16x128xf32>
    %27 = vector.broadcast %10 : vector<1x128xf32> to vector<16x128xf32>
    %28 = arith.addf %26, %27 : vector<16x128xf32>
    %29 = tpu.iota {dimensions = array<i32: 1>} : vector<16x128xi32>
    %c4_i32 = arith.constant 4 : i32
    %30 = vector.broadcast %c4_i32 : i32 to vector<16x128xi32>
    %31 = arith.cmpi slt, %29, %30 : vector<16x128xi32>
    %cst_14 = arith.constant 0xFF800000 : f32
    %32 = vector.broadcast %cst_14 : f32 to vector<16x128xf32>
    %33 = arith.select %31, %28, %32 : vector<16x128xi1>, vector<16x128xf32>
    %cst_15 = arith.constant dense<0xFF800000> : vector<16xf32>
    %34 = vector.multi_reduction <maximumf>, %33, %cst_15 [1] : vector<16x128xf32> to vector<16xf32>
    %35 = vector.shape_cast %34 : vector<16xf32> to vector<16x1xf32>
    %36 = vector.broadcast %35 : vector<16x1xf32> to vector<16x128xf32>
    %37 = arith.cmpf oeq, %33, %36 : vector<16x128xf32>
    %c128_i32 = arith.constant 128 : i32
    %38 = vector.broadcast %c128_i32 : i32 to vector<16x128xi32>
    %39 = arith.select %37, %29, %38 : vector<16x128xi1>, vector<16x128xi32>
    %cst_16 = arith.constant dense<2147483647> : vector<16xi32>
    %40 = vector.multi_reduction <minsi>, %39, %cst_16 [1] : vector<16x128xi32> to vector<16xi32>
    %41 = vector.shape_cast %40 : vector<16xi32> to vector<16x1xi32>
    %42 = vector.broadcast %41 : vector<16x1xi32> to vector<16x128xi32>
    %43 = arith.cmpi eq, %29, %42 : vector<16x128xi32>
    %cst_17 = arith.constant 1.000000e+00 : f32
    %cst_18 = arith.constant 0.000000e+00 : f32
    %44 = vector.broadcast %cst_17 : f32 to vector<16x128xf32>
    %45 = vector.broadcast %cst_18 : f32 to vector<16x128xf32>
    %46 = arith.select %43, %44, %45 : vector<16x128xi1>, vector<16x128xf32>
    %47 = arith.truncf %46 : vector<16x128xf32> to vector<16x128xbf16>
    %cst_19 = arith.constant dense<0.000000e+00> : vector<16x128xf32>
    %48 = tpu.matmul %47, %6, %cst_19 {dimension_numbers = #tpu.dot_dimension_numbers<[1], [0], [0], [1], [0, 0, 1, 1], [], []>} : vector<16x128xbf16>, vector<128x128xbf16>, vector<16x128xf32> -> vector<16x128xf32>
    %49 = arith.addf %21, %48 : vector<16x128xf32>
    %cst_20 = arith.constant 0.00999999977 : f32
    %50 = vector.broadcast %cst_20 : f32 to vector<16x128xf32>
    %51 = arith.mulf %50, %49 : vector<16x128xf32>
    %52 = arith.maximumf %49, %51 : vector<16x128xf32>
    %53 = arith.truncf %52 : vector<16x128xf32> to vector<16x128xbf16>
    %cst_21 = arith.constant dense<0.000000e+00> : vector<16x128xf32>
    %54 = tpu.matmul %53, %8, %cst_21 {dimension_numbers = #tpu.dot_dimension_numbers<[1], [0], [0], [1], [0, 0, 1, 1], [], []>} : vector<16x128xbf16>, vector<128x128xbf16>, vector<16x128xf32> -> vector<16x128xf32>
    %55 = arith.addf %28, %54 : vector<16x128xf32>
    %56 = arith.truncf %55 : vector<16x128xf32> to vector<16x128xbf16>
    %c0_22 = arith.constant 0 : index
    %c0_23 = arith.constant 0 : index
    %57 = vector.load %arg3[%c0_22, %c0_23] : memref<16x128xbf16, #tpu.memory_space<vmem>>, vector<16x128xbf16>
    tpu.vector_store %arg3[%c0_22, %c0_23], %56 {strides = array<i32>} : memref<16x128xbf16, #tpu.memory_space<vmem>>, vector<16x128xbf16>,
    return
  }
  func.func @transform_0(%arg0: i32) -> (i32, i32) {
    %c0_i32 = arith.constant 0 : i32
    %c0_i32_0 = arith.constant 0 : i32
    return %arg0, %c0_i32 : i32, i32
  }
  func.func @transform_1(%arg0: i32) -> (i32, i32) {
    %c0_i32 = arith.constant 0 : i32
    %c0_i32_0 = arith.constant 0 : i32
    %c0_i32_1 = arith.constant 0 : i32
    return %c0_i32, %c0_i32_0 : i32, i32
  }
  func.func @transform_2(%arg0: i32) -> (i32, i32) {
    %c0_i32 = arith.constant 0 : i32
    %c0_i32_0 = arith.constant 0 : i32
    return %arg0, %c0_i32 : i32, i32
  }
}

</mosaic_0001>

<bundles_post_ra>
// kernel: tpu_custom_call.1
= control target key start
LH: loop header
LB: loop body
LE: loop exit
PB: predicated region body
PF: predicated region fallthrough
CT: control target
= control target key end

     0   :  { %7 = vsyncpa [#allocation3], 0  ;;  %s1066_s0 = inlined_call_operand.hbm [shape: bf16[16,32], index: 0, kind: input, shape index: {}]   ;;  %s1067_s1 = inlined_call_operand.hbm [shape: bf16[592,128], index: 1, kind: input, shape index: {}]   ;;  %s1068_s2 = inlined_call_operand.hbm [shape: bf16[16,128], index: 2, kind: output, shape index: {}]  }
   0x1   :  { %8 = vsyncpa [#allocation6], 0 }
   0x2   :  { %9 = vsyncpa [#allocation4], 0  ;;  %s929_s9 = smov [#allocation2]   ;;  %s857_s13 = scalar_lea.hbm %s1066_s0, 128 }
   0x3   :  { %s15_s10 = sshll.u32 %s929_s9, 4  ;;  %p858_p0 = scmp.ne.s32.totalorder %s1066_s0, %s857_s13  ;;  %s16_s10 = int_to_ptr.vmem [resolvable:$true] %s15_s10 }
   0x4   :  { %p861_p1 = scmp.lt.u32.totalorder %s857_s13, %s1066_s0 }
   0x6   :  { %p863_p2 = pnand %p861_p1, %p858_p0 }
   0x8   :  { %866 = shalt.err (!%p863_p2)
}
   0x9   :  { %s867_s18 = scalar_lea.vmem %s16_s10, 128  ;;  %p872_p4 = scmp.lt.s32.totalorder %s16_s10, %s16_s10 }
   0xa   :  { %p868_p3 = scmp.ne.s32.totalorder %s16_s10, %s867_s18  ;;  %p873_p5 = scmp.lt.s32.totalorder %s867_s18, %s867_s18 }
   0xc   :  { %p874_p6 = por %p873_p5, %p872_p4 }
   0xe   :  { %p875_p7 = pnand %p874_p6, %p868_p3 }
  0x10   :  { %878 = shalt.err (!%p875_p7)
}
  0x11   :  { %s930_s19 = smov 64   ;;  %s931_s20 = smov 4  }
  0x12   :  { %21 = dma.hbm_to_vmem [thread:$0]  %s1066_s0, 128, %s16_s10, [#allocation3], %s930_s19, %s930_s19, %s931_s20  }
  0x13   :  { %s932_s23 = smov [#allocation5]   ;;  %s879_s27 = scalar_lea.hbm %s1067_s1, 4736 }
  0x14   :  { %s27_s24 = sshll.u32 %s932_s23, 4  ;;  %p880_p8 = scmp.ne.s32.totalorder %s1067_s1, %s879_s27  ;;  %s28_s24 = int_to_ptr.vmem [resolvable:$true] %s27_s24 }
  0x15   :  { %p883_p9 = scmp.lt.u32.totalorder %s879_s27, %s1067_s1 }
  0x17   :  { %p885_p10 = pnand %p883_p9, %p880_p8 }
  0x19   :  { %888 = shalt.err (!%p885_p10)
}
  0x1a   :  { %s889_s4 = scalar_lea.vmem %s28_s24, 4736  ;;  %p894_p12 = scmp.lt.s32.totalorder %s28_s24, %s28_s24 }
  0x1b   :  { %p890_p11 = scmp.ne.s32.totalorder %s28_s24, %s889_s4  ;;  %p895_p13 = scmp.lt.s32.totalorder %s889_s4, %s889_s4 }
  0x1d   :  { %p896_p0 = por %p895_p13, %p894_p12 }
  0x1f   :  { %p897_p1 = pnand %p896_p0, %p890_p11 }
  0x21   :  { %900 = shalt.err (!%p897_p1)
}
  0x22   :  { %33 = dma.hbm_to_vmem [thread:$0]  %s1067_s1, 4736, %s28_s24, [#allocation6], %s930_s19, %s930_s19, %s931_s20  }
  0x23   :  { %923 = dma.done.wait [#allocation3], 128  }
  0x24   :  { %924 = vsyncadd [#allocation3], 4294967168 }
  0x25   :  { %925 = dma.done.wait [#allocation6], 4736  }
  0x26   :  { %926 = vsyncadd [#allocation6], 4294962560  ;;  %v933_v0 = vmov 0.0   ;;  %vm934_vm0 = vmmov 0   ;;  %v822_v1 = vld [vmem:[#allocation5] sm:$0xff]   ;;  %v823_v2 = vld [vmem:[#allocation5 + $0x8] sm:$0xff]   ;;  %v117_v17 = vlaneseq }
  0x27   :  { %726 = vmatprep.subr.bf16.mxu0 %v933_v0  ;;  %730 = vmatprep.mubr.msk.bf16.mxu0 %vm934_vm0, %v933_v0  ;;  %v825_v3 = vld [vmem:[#allocation5 + $0x18] sm:$0xff]   ;;  %v826_v5 = vld [vmem:[#allocation5 + $0x20] sm:$0xff]   ;;  %vm138_vm1 = vcmask 261120   ;;  %v827_v6 = vld [vmem:[#allocation5 + $0x28] sm:$0xff]   ;;  %s936_s1 = smov [#allocation7]  }
  0x28   :  { %734 = vmatprep.subr.bf16.mxu1 %v933_v0  ;;  %750 = vmatprep.mubr.msk.bf16.mxu1 %vm934_vm0, %v933_v0  ;;  %v824_v4 = vld [vmem:[#allocation2] sm:$0xff]   ;;  %v828_v7 = vld [vmem:[#allocation5 + $0x30] sm:$0xff]   ;;  %v830_v9 = vld [vmem:[#allocation5 + $0x40] sm:$0xff]   ;;  %v118_v18 = vshrl.u32 %v117_v17, 7  ;;  %v1020_v53 = vand.u32 127, %v117_v17  ;;  %s627_s6 = sshll.u32 %s936_s1, 4  ;;  %s628_s6 = int_to_ptr.vmem [resolvable:$true] %s627_s6 }
  0x29   :  { %727 = vmatpush3.bf16.msra.mxu0 %v822_v1  ;;  %735 = vmatpush3.bf16.msra.mxu1 %v825_v3  ;;  %v829_v8 = vld [vmem:[#allocation5 + $0x38] sm:$0xff]   ;;  %v831_v10 = vld [vmem:[#allocation5 + $0x48] sm:$0xff]   ;;  %v832_v11 = vld [vmem:[#allocation5 + $0x50] sm:$0xff]   ;;  %s901_s7 = scalar_lea.vmem %s628_s6, 128  ;;  %p906_p3 = scmp.lt.s32.totalorder %s628_s6, %s628_s6 }
  0x2a   :  { %728 = vmatprep.subr.bf16.mxu0 %v933_v0  ;;  %736 = vmatprep.subr.bf16.mxu1 %v933_v0  ;;  %v833_v12 = vld [vmem:[#allocation5 + $0xa0] sm:$0xff]   ;;  %v834_v13 = vld [vmem:[#allocation5 + $0xa8] sm:$0xff]   ;;  %v835_v14 = vld [vmem:[#allocation5 + $0xb0] sm:$0xff]   ;;  %v119_v21 = vsub.s32 0, %v118_v18  ;;  %vm381_vm2 = vcmp.lt.s32.totalorder %v1020_v53, 4  ;;  %p902_p2 = scmp.ne.s32.totalorder %s628_s6, %s901_s7  ;;  %p907_p4 = scmp.lt.s32.totalorder %s901_s7, %s901_s7 }
  0x2b   :  { %v836_v15 = vld [vmem:[#allocation5 + $0xb8] sm:$0xff]   ;;  %v837_v16 = vld [vmem:[#allocation5 + $0xc0] sm:$0xff]   ;;  %v45_v19 = vld [vmem:[#allocation5 + $0x10] sm:$0x1] }
  0x2c   :  { %v46_v20 = vunpack.c.l.bf16 %v45_v19  ;;  %v838_v34 = vld [vmem:[#allocation5 + $0xc8] sm:$0xff]   ;;  %v839_v35 = vld [vmem:[#allocation5 + $0xd0] sm:$0xff]   ;;  %v840_v36 = vld [vmem:[#allocation5 + $0xd8] sm:$0xff]   ;;  %p908_p5 = por %p907_p4, %p906_p3 }
  0x2d   :  { %729 = vmatpush3.bf16.msra.mxu0 %v823_v2  ;;  %737 = vmatpush3.bf16.msra.mxu1 %v826_v5  ;;  %v63_v37 = vld [vmem:[#allocation5 + $0x58] sm:$0x1]  ;;  %v113_v51 = vld [vmem:[#allocation5 + $0x120] sm:$0x1] }
  0x2e   :  { %754 = vmatprep.subr.bf16.mxu0 %v933_v0  ;;  %738 = vmatprep.subr.bf16.mxu1 %v933_v0  ;;  %v120_v22 = vrot.slane %v46_v20, %v119_v21  ;;  %v64_v38 = vunpack.c.l.bf16 %v63_v37  ;;  %v114_v52 = vunpack.c.l.bf16 %v113_v51  ;;  %p909_p6 = pnand %p908_p5, %p902_p2 }
  0x30   :  { %731 = vmatmul.mubr.msk.bf16.vlgmr.msra.gmra.mrb[0].mxu0 %vm138_vm1, %v824_v4  ;;  %v191_v39 = vrot.slane %v64_v38, %v119_v21  ;;  %v289_v54 = vrot.slane %v114_v52, %v119_v21 }
  0x31   :  { %770 = vmatprep.mubr.msk.bf16.mxu0 %vm934_vm0, %v933_v0  ;;  %739 = vmatpush3.bf16.msra.mxu1 %v827_v6 }
  0x32   :  { %740 = vmatprep.subr.bf16.mxu1 %v933_v0  ;;  %755 = vmatpush3.bf16.msra.mxu0 %v833_v12  ;;  %v845_v12 = vld [vmem:[#allocation5 + $0x80] sm:$0xff]  }
  0x33   :  { %756 = vmatprep.subr.bf16.mxu0 %v933_v0 }
  0x35   :  { %741 = vmatpush3.bf16.msra.mxu1 %v828_v7 }
  0x36   :  { %742 = vmatprep.subr.bf16.mxu1 %v933_v0  ;;  %757 = vmatpush3.bf16.msra.mxu0 %v834_v13  ;;  %v846_v13 = vld [vmem:[#allocation5 + $0x88] sm:$0xff]  }
  0x37   :  { %758 = vmatprep.subr.bf16.mxu0 %v933_v0 }
  0x39   :  { %743 = vmatpush3.bf16.msra.mxu1 %v829_v8  ;;  %v841_v8 = vld [vmem:[#allocation5 + $0x60] sm:$0xff]  }
  0x3a   :  { %744 = vmatprep.subr.bf16.mxu1 %v933_v0  ;;  %759 = vmatpush3.bf16.msra.mxu0 %v835_v14 }
  0x3b   :  { %760 = vmatprep.subr.bf16.mxu0 %v933_v0 }
  0x3d   :  { %745 = vmatpush3.bf16.msra.mxu1 %v830_v9  ;;  %v842_v9 = vld [vmem:[#allocation5 + $0x68] sm:$0xff]  }
  0x3e   :  { %746 = vmatprep.subr.bf16.mxu1 %v933_v0  ;;  %761 = vmatpush3.bf16.msra.mxu0 %v836_v15 }
  0x3f   :  { %762 = vmatprep.subr.bf16.mxu0 %v933_v0 }
  0x41   :  { %747 = vmatpush3.bf16.msra.mxu1 %v831_v10  ;;  %v843_v10 = vld [vmem:[#allocation5 + $0x70] sm:$0xff]  }
  0x42   :  { %748 = vmatprep.subr.bf16.mxu1 %v933_v0  ;;  %763 = vmatpush3.bf16.msra.mxu0 %v837_v16 }
  0x43   :  { %764 = vmatprep.subr.bf16.mxu0 %v933_v0 }
  0x45   :  { %749 = vmatpush3.bf16.msra.mxu1 %v832_v11  ;;  %v844_v11 = vld [vmem:[#allocation5 + $0x78] sm:$0xff]  }
  0x46   :  { %774 = vmatprep.subr.bf16.mxu1 %v933_v0  ;;  %765 = vmatpush3.bf16.msra.mxu0 %v838_v34 }
  0x47   :  { %766 = vmatprep.subr.bf16.mxu0 %v933_v0 }
  0x4a   :  { %767 = vmatpush3.bf16.msra.mxu0 %v839_v35 }
  0x4b   :  { %768 = vmatprep.subr.bf16.mxu0 %v933_v0 }
  0x4e   :  { %769 = vmatpush3.bf16.msra.mxu0 %v840_v36 }
  0x4f   :  { %794 = vmatprep.subr.bf16.mxu0 %v933_v0 }
 0x103   :  { %v176_v23 = vpop.f32.mrb[0].mxu0 }
 0x104   :  { %v177_v24 = vadd.f32 %v176_v23, %v120_v22  ;;  %v732_v25 = vpop.f32.mrb[1].mxu0  ;;  %v848_v23 = vld [vmem:[#allocation5 + $0x98] sm:$0xff]  }
 0x105   :  { %v179_v26 = vpop.f32.mrb[2].mxu0  ;;  %v850_v25 = vld [vmem:[#allocation5 + $0xe8] sm:$0xff]  }
 0x106   :  { %v183_v27 = vmul.f32 0.01, %v177_v24  ;;  %v180_v28 = vadd.f32 %v179_v26, %v120_v22  ;;  %v733_v29 = vpop.f32.mrb[3].mxu0  ;;  %v847_v22 = vld [vmem:[#allocation5 + $0x90] sm:$0xff]  }
 0x107   :  { %v851_v26 = vld [vmem:[#allocation5 + $0xf0] sm:$0xff]  }
 0x108   :  { %v184_v30 = vmul.f32 0.01, %v180_v28  ;;  %v185_v31 = vmax.f32 %v177_v24, %v183_v27  ;;  %v849_v24 = vld [vmem:[#allocation5 + $0xe0] sm:$0xff]   ;;  %v852_v27 = vld [vmem:[#allocation5 + $0xf8] sm:$0xff]  }
 0x10a   :  { %v186_v32 = vmax.f32 %v180_v28, %v184_v30  ;;  %v853_v28 = vld [vmem:[#allocation5 + $0x100] sm:$0xff]  }
 0x10c   :  { %v187_v33 = vpack.c.bf16 %v186_v32, %v185_v31 }
 0x10e   :  { %751 = vmatmul.mubr.bf16.vlgmr.msra.gmra.mrb[0].mxu1 %v187_v33 }
 0x10f   :  { %790 = vmatprep.mubr.msk.bf16.mxu1 %vm934_vm0, %v933_v0  ;;  %775 = vmatpush3.bf16.msra.mxu1 %v841_v8 }
 0x110   :  { %776 = vmatprep.subr.bf16.mxu1 %v933_v0 }
 0x113   :  { %777 = vmatpush3.bf16.msra.mxu1 %v842_v9 }
 0x114   :  { %778 = vmatprep.subr.bf16.mxu1 %v933_v0 }
 0x117   :  { %779 = vmatpush3.bf16.msra.mxu1 %v843_v10 }
 0x118   :  { %780 = vmatprep.subr.bf16.mxu1 %v933_v0 }
 0x11b   :  { %781 = vmatpush3.bf16.msra.mxu1 %v844_v11 }
 0x11c   :  { %782 = vmatprep.subr.bf16.mxu1 %v933_v0 }
 0x11f   :  { %783 = vmatpush3.bf16.msra.mxu1 %v845_v12 }
 0x120   :  { %784 = vmatprep.subr.bf16.mxu1 %v933_v0 }
 0x123   :  { %785 = vmatpush3.bf16.msra.mxu1 %v846_v13 }
 0x124   :  { %786 = vmatprep.subr.bf16.mxu1 %v933_v0 }
 0x127   :  { %787 = vmatpush3.bf16.msra.mxu1 %v847_v22 }
 0x128   :  { %788 = vmatprep.subr.bf16.mxu1 %v933_v0 }
 0x12b   :  { %789 = vmatpush3.bf16.msra.mxu1 %v848_v23 }
 0x1e1   :  { %v274_v40 = vpop.f32.mrb[0].mxu1 }
 0x1e2   :  { %v1010_v41 = vadd.f32 %v274_v40, %v191_v39  ;;  %v752_v42 = vpop.f32.mrb[1].mxu1  ;;  %v854_v40 = vld [vmem:[#allocation5 + $0x108] sm:$0xff]  }
 0x1e3   :  { %v277_v43 = vpop.f32.mrb[2].mxu1  ;;  %v855_v42 = vld [vmem:[#allocation5 + $0x110] sm:$0xff]  }
 0x1e4   :  { %v281_v44 = vmul.f32 0.01, %v1010_v41  ;;  %v1013_v45 = vadd.f32 %v277_v43, %v191_v39  ;;  %v753_v46 = vpop.f32.mrb[3].mxu1  ;;  %v935_v39 = vmov 1.0|1.0   ;;  %v856_v43 = vld [vmem:[#allocation5 + $0x118] sm:$0xff]  }
 0x1e6   :  { %v282_v47 = vmul.f32 0.01, %v1013_v45  ;;  %v283_v48 = vmax.f32 %v1010_v41, %v281_v44 }
 0x1e8   :  { %v284_v49 = vmax.f32 %v1013_v45, %v282_v47 }
 0x1ea   :  { %v285_v50 = vpack.c.bf16 %v284_v49, %v283_v48 }
 0x1ec   :  { %771 = vmatmul.mubr.bf16.vlgmr.msra.gmra.mrb[4].mxu0 %v285_v50 }
 0x1ed   :  { %810 = vmatprep.mubr.msk.bf16.mxu0 %vm934_vm0, %v933_v0  ;;  %795 = vmatpush3.bf16.msra.mxu0 %v849_v24 }
 0x1ee   :  { %796 = vmatprep.subr.bf16.mxu0 %v933_v0 }
 0x1f1   :  { %797 = vmatpush3.bf16.msra.mxu0 %v850_v25 }
 0x1f2   :  { %798 = vmatprep.subr.bf16.mxu0 %v933_v0 }
 0x1f5   :  { %799 = vmatpush3.bf16.msra.mxu0 %v851_v26 }
 0x1f6   :  { %800 = vmatprep.subr.bf16.mxu0 %v933_v0 }
 0x1f9   :  { %801 = vmatpush3.bf16.msra.mxu0 %v852_v27 }
 0x1fa   :  { %802 = vmatprep.subr.bf16.mxu0 %v933_v0 }
 0x1fd   :  { %803 = vmatpush3.bf16.msra.mxu0 %v853_v28 }
 0x1fe   :  { %804 = vmatprep.subr.bf16.mxu0 %v933_v0 }
 0x201   :  { %805 = vmatpush3.bf16.msra.mxu0 %v854_v40 }
 0x202   :  { %806 = vmatprep.subr.bf16.mxu0 %v933_v0 }
 0x205   :  { %807 = vmatpush3.bf16.msra.mxu0 %v855_v42 }
 0x206   :  { %808 = vmatprep.subr.bf16.mxu0 %v933_v0 }
 0x209   :  { %809 = vmatpush3.bf16.msra.mxu0 %v856_v43 }
 0x2bf   :  { %v372_v55 = vpop.f32.mrb[4].mxu0 }
 0x2c0   :  { %v1023_v56 = vadd.f32 %v372_v55, %v289_v54  ;;  %v772_v57 = vpop.f32.mrb[5].mxu0 }
 0x2c1   :  { %v375_v58 = vpop.f32.mrb[6].mxu0 }
 0x2c2   :  { %v1025_v59 = vadd.f32 %v375_v58, %v289_v54  ;;  %v773_v60 = vpop.f32.mrb[7].mxu0  ;;  %v382_v61 = vsel %vm381_vm2, %v1023_v56, -inf }
 0x2c3   :  { %384 = vmax.xlane.f32.xlu0 %v382_v61 }
 0x2c4   :  { %v383_v62 = vsel %vm381_vm2, %v1025_v59, -inf }
 0x2c7   :  { %386 = vmax.xlane.f32.xlu0 %v383_v62 }
 0x350   :  { %v385_v63 = vpop.xlane.xlu0 %384 }
 0x351   :  { %vm388_vm3 = vcmp.eq.f32.partialorder %v382_v61, %v385_v63 }
 0x352   :  { %v390_v1 = vsel %vm388_vm3, %v1020_v53, 128 }
 0x353   :  { %v393_v2 = vshra.s32 %v390_v1, 16  ;;  %v392_v14 = vand.u32 65535, %v390_v1 }
 0x354   :  { %v387_v3 = vpop.xlane.xlu0 %386 }
 0x355   :  { %vm389_vm4 = vcmp.eq.f32.partialorder %v383_v62, %v387_v3  ;;  %v395_v4 = vcvt.s32.f32 %v393_v2  ;;  %v394_v17 = vcvt.s32.f32 %v392_v14 }
 0x356   :  { %v391_v5 = vsel %vm389_vm4, %v1020_v53, 128 }
 0x357   :  { %396 = vmin.xlane.f32.xlu1 %v395_v4  ;;  %v407_v6 = vshra.s32 %v391_v5, 16  ;;  %v406_v15 = vand.u32 65535, %v391_v5 }
 0x359   :  { %v409_v7 = vcvt.s32.f32 %v407_v6  ;;  %v408_v20 = vcvt.s32.f32 %v406_v15 }
 0x35b   :  { %410 = vmin.xlane.f32.xlu1 %v409_v7 }
 0x3e4   :  { %v397_v16 = vpop.xlane.xlu1 %396 }
 0x3e5   :  { %vm398_vm5 = vcmp.eq.f32.partialorder %v395_v4, %v397_v16  ;;  %v403_v29 = vcvt.f32.s32 %v397_v16 }
 0x3e6   :  { %v399_v18 = vsel %vm398_vm5, %v394_v17, inf }
 0x3e7   :  { %400 = vmin.xlane.f32.xlu0 %v399_v18  ;;  %v404_v33 = vshll.u32 %v403_v29, 16 }
 0x3e8   :  { %v411_v19 = vpop.xlane.xlu1 %410 }
 0x3e9   :  { %vm412_vm6 = vcmp.eq.f32.partialorder %v409_v7, %v411_v19  ;;  %v417_v31 = vcvt.f32.s32 %v411_v19 }
 0x3ea   :  { %v413_v21 = vsel %vm412_vm6, %v408_v20, inf }
 0x3eb   :  { %414 = vmin.xlane.f32.xlu1 %v413_v21  ;;  %v418_v35 = vshll.u32 %v417_v31, 16 }
 0x474   :  { %v401_v30 = vpop.xlane.xlu0 %400 }
 0x475   :  { %v402_v32 = vcvt.f32.s32 %v401_v30 }
 0x477   :  { %v405_v36 = vadd.s32 %v404_v33, %v402_v32 }
 0x478   :  { %v415_v34 = vpop.xlane.xlu1 %414 }
 0x479   :  { %v416_v37 = vcvt.f32.s32 %v415_v34  ;;  %vm420_vm7 = vcmp.eq.s32.totalorder %v1020_v53, %v405_v36 }
 0x47b   :  { %v419_v38 = vadd.s32 %v418_v35, %v416_v37 }
 0x47d   :  { %vm421_vm8 = vcmp.eq.s32.totalorder %v1020_v53, %v419_v38 }
 0x47e   :  { %vm668_vm9 = vmpackc.low %vm421_vm8, %vm420_vm7 }
 0x47f   :  { %791 = vmatmul.mubr.msk.bf16.vlgmr.msra.gmra.mrb[4].mxu1 %vm668_vm9, %v935_v39 }
 0x552   :  { %v507_v44 = vpop.f32.mrb[4].mxu1 }
 0x553   :  { %v514_v46 = vadd.f32 %v507_v44, %v1010_v41  ;;  %v792_v47 = vpop.f32.mrb[5].mxu1 }
 0x554   :  { %v510_v48 = vpop.f32.mrb[6].mxu1 }
 0x555   :  { %v516_v49 = vmul.f32 0.01, %v514_v46  ;;  %v515_v50 = vadd.f32 %v510_v48, %v1013_v45  ;;  %v793_v51 = vpop.f32.mrb[7].mxu1 }
 0x557   :  { %v517_v52 = vmul.f32 0.01, %v515_v50  ;;  %v518_v53 = vmax.f32 %v514_v46, %v516_v49 }
 0x559   :  { %v519_v54 = vmax.f32 %v515_v50, %v517_v52 }
 0x55b   :  { %v520_v55 = vpack.c.bf16 %v519_v54, %v518_v53 }
 0x55d   :  { %811 = vmatmul.mubr.bf16.vlgmr.msra.gmra.mrb[8].mxu0 %v520_v55 }
 0x630   :  { %v603_v57 = vpop.f32.mrb[8].mxu0 }
 0x631   :  { %v812_v58 = vpop.f32.mrb[9].mxu0  ;;  %v610_v0 = vadd.f32 %v603_v57, %v1023_v56 }
 0x632   :  { %v606_v60 = vpop.f32.mrb[10].mxu0 }
 0x633   :  { %v611_v41 = vadd.f32 %v606_v60, %v1025_v59  ;;  %v813_v61 = vpop.f32.mrb[11].mxu0 }
 0x635   :  { %v685_v62 = vpack.c.bf16 %v611_v41, %v610_v0 }
 0x637   :  { %686 = vst [vmem:[#allocation7] sm:$0xff] %v685_v62  }
 0x638   :  { %912 = shalt.err (!%p909_p6)
}
 0x639   :  { %s913_s10 = scalar_lea.hbm %s1068_s2, 128 }
 0x63a   :  { %p914_p7 = scmp.ne.s32.totalorder %s1068_s2, %s913_s10  ;;  %p917_p8 = scmp.lt.u32.totalorder %s913_s10, %s1068_s2 }
 0x63c   :  { %p919_p9 = pnand %p917_p8, %p914_p7 }
 0x63e   :  { %922 = shalt.err (!%p919_p9)
}
 0x63f   :  { %633 = dma.vmem_to_hbm [thread:$0]  %s628_s6, 128, %s1068_s2, [#allocation4], %s930_s19, %s930_s19, %s931_s20  }
 0x640   :  { %927 = dma.done.wait [#allocation4], 128  }
 0x641   :  { %928 = vsyncadd [#allocation4], 4294967168 }
 0x642   :  { %637 = vsyncpa [#allocation3], 1 }
 0x643   :  { %638 = vsyncpa [#allocation6], 1 }
 0x644   :  { %639 = vsyncpa [#allocation4], 1 }

</bundles_post_ra>
